<compile_context>
chip_gen: v6e
topology: v6e:2x2x1
jax: 0.10.0
libtpu: 0.0.40
codegen_flags: <defaults>
</compile_context>

<pallas_src>
import math

import jax
import jax.numpy as jnp
from jax.experimental import pallas as pl
from jax.experimental.pallas import tpu as pltpu

BN_EPS = 1e-5

# VMEM budget: sized against v7x's 64 MiB physical VMEM (the tightest chip) while
# still being well inside the large-tile / HBM-roofline regime on v5e/v6e.
_MAX_X_TILE_BYTES = 6 << 20     # target bytes per x tile buffer (f32-equivalent)
_VMEM_LIMIT_BYTES = 48 << 20    # explicit scoped-VMEM limit for every pallas_call
_FUSED_X_BYTES = 4 << 20        # small-problem fast path threshold for x (f32 bytes)


# --------------------------------------------------------------------------- #
# Helpers
# --------------------------------------------------------------------------- #
def _round_up(x, m):
    return (x + m - 1) // m * m


def _sublane_granularity(dtype):
    """Rows per fully-packed vreg sublane group: 8 (f32), 16 (bf16), 32 (int8/fp8)."""
    return max(8, 8 * (4 // jnp.dtype(dtype).itemsize))


def _choose_batch_tile(batch, heads, d_hidden, gran):
    """Batches per pass-2 tile (tile rows = bt*heads).

    bt is a multiple of bt_step so that (a) bt (rw / out sublane dim) is a multiple
    of 8 and (b) bt*heads (x sublane dim) matches the dtype packing granularity.
    """
    bt_step = math.lcm(8, gran // math.gcd(gran, heads))
    bytes_per_batch = 4 * heads * d_hidden           # f32-equivalent accounting
    bt = max(1, _MAX_X_TILE_BYTES // bytes_per_batch)
    # Keep at least 2 grid steps so v7x's 2 TensorCores both get work.
    if batch > bt_step:
        bt = min(bt, _round_up(-(-batch // 2), bt_step))
    bt = max(bt_step, (bt // bt_step) * bt_step)
    return bt


# --------------------------------------------------------------------------- #
# Pass 1: global BatchNorm batch statistics (sum, sum of squares) over N = B*H
# --------------------------------------------------------------------------- #
def _bn_stats_kernel(x_ref, sum_ref, sq_ref):
    x = x_ref[...].astype(jnp.float32)

    @pl.when(pl.program_id(0) == 0)
    def _():
        sum_ref[...] = jnp.zeros_like(sum_ref)
        sq_ref[...] = jnp.zeros_like(sq_ref)

    sum_ref[...] += jnp.sum(x, axis=0, keepdims=True)
    sq_ref[...] += jnp.sum(x * x, axis=0, keepdims=True)


# --------------------------------------------------------------------------- #
# Pass 2: apply hoisted BN scale/shift + Swish + Linear (+ weighted head sum)
# --------------------------------------------------------------------------- #
def _make_apply_kernel(bt, heads, d_hidden, weighted):
    if weighted:
        def kernel(x_ref, rw_ref, scale_ref, shift_ref, w_ref, b_ref, out_ref):
            x = x_ref[...].astype(jnp.float32)                 # (bt*heads, d_hidden)
            h = x * scale_ref[...] + shift_ref[...]            # BatchNorm1d (train stats)
            h = h * jax.nn.sigmoid(h)                          # Swish (EUP sigmoid)
            rw = rw_ref[...].astype(jnp.float32)               # (bt, heads)
            # Relevance-weighted head reduction BEFORE the matmul (Linear is linear):
            # heads x fewer MXU FLOPs, (bt, d_hidden) operand instead of (bt*heads, .).
            hw = jnp.sum(h.reshape(bt, heads, d_hidden) * rw[:, :, None], axis=1)
            y = jnp.dot(hw.astype(w_ref.dtype), w_ref[...],
                        preferred_element_type=jnp.float32)
            y = y + b_ref[...].astype(jnp.float32) * jnp.sum(rw, axis=1, keepdims=True)
            out_ref[...] = y.astype(out_ref.dtype)
    else:
        def kernel(x_ref, scale_ref, shift_ref, w_ref, b_ref, out_ref):
            x = x_ref[...].astype(jnp.float32)
            h = x * scale_ref[...] + shift_ref[...]
            h = h * jax.nn.sigmoid(h)
            y = jnp.dot(h.astype(w_ref.dtype), w_ref[...],
                        preferred_element_type=jnp.float32)
            out_ref[...] = (y + b_ref[...].astype(jnp.float32)).astype(out_ref.dtype)
    return kernel


# --------------------------------------------------------------------------- #
# Small-problem fast path: everything (stats + BN + Swish + Linear + head sum)
# fused in one kernel with x resident in VMEM.
# --------------------------------------------------------------------------- #
def _make_fused_kernel(batch, heads, d_hidden, n_rows, weighted):
    inv_n = 1.0 / float(n_rows)

    def _bn_swish(x_ref, gamma_ref, beta_ref):
        x = x_ref[...].astype(jnp.float32)
        mean = jnp.sum(x, axis=0, keepdims=True) * inv_n
        xc = x - mean
        var = jnp.sum(xc * xc, axis=0, keepdims=True) * inv_n   # centered (x resident)
        scale = gamma_ref[...].astype(jnp.float32) * jax.lax.rsqrt(var + BN_EPS)
        h = xc * scale + beta_ref[...].astype(jnp.float32)
        return h * jax.nn.sigmoid(h)

    if weighted:
        def kernel(x_ref, rw_ref, gamma_ref, beta_ref, w_ref, b_ref, out_ref):
            h = _bn_swish(x_ref, gamma_ref, beta_ref)
            rw = rw_ref[...].astype(jnp.float32)
            hw = jnp.sum(h.reshape(batch, heads, d_hidden) * rw[:, :, None], axis=1)
            y = jnp.dot(hw.astype(w_ref.dtype), w_ref[...],
                        preferred_element_type=jnp.float32)
            y = y + b_ref[...].astype(jnp.float32) * jnp.sum(rw, axis=1, keepdims=True)
            out_ref[...] = y.astype(out_ref.dtype)
    else:
        def kernel(x_ref, gamma_ref, beta_ref, w_ref, b_ref, out_ref):
            h = _bn_swish(x_ref, gamma_ref, beta_ref)
            y = jnp.dot(h.astype(w_ref.dtype), w_ref[...],
                        preferred_element_type=jnp.float32)
            out_ref[...] = (y + b_ref[...].astype(jnp.float32)).astype(out_ref.dtype)
    return kernel


# --------------------------------------------------------------------------- #
# Wrapper
# --------------------------------------------------------------------------- #
def aggregator_forward(x_concepts_encoded, relevance_weights, params,
                       ignore_relevance_weights=False, mxu_dtype=None):
    batch, heads = relevance_weights.shape
    n_rows = batch * heads
    x2d = x_concepts_encoded.reshape(n_rows, -1)              # native dtype, no up-cast
    d_hidden = x2d.shape[-1]
    d_out = params["w"].shape[0]
    d_out_p = _round_up(d_out, 128)                           # lane-dense output slab

    # MXU operand dtype follows the weights (pass bf16 params / mxu_dtype=bf16 for
    # bf16 MXU throughput on v5e/v6e/v7x).
    w_dtype = jnp.dtype(mxu_dtype) if mxu_dtype is not None else params["w"].dtype
    w_p = jnp.pad(params["w"].T.astype(w_dtype), ((0, 0), (0, d_out_p - d_out)))
    b_p = jnp.pad(params["b"].astype(jnp.float32),
                  (0, d_out_p - d_out)).reshape(1, d_out_p)
    gamma = params["gamma"].reshape(1, d_hidden)
    beta = params["beta"].reshape(1, d_hidden)

    weighted = not ignore_relevance_weights
    out_dtype = jnp.float32 if weighted else x2d.dtype        # lighter writeback when (N, d_out)
    x_f32_bytes = n_rows * d_hidden * 4

    # ---------------- small-problem fast path: one fused launch, x stays resident ----
    if x_f32_bytes <= _FUSED_X_BYTES:
        kernel = _make_fused_kernel(batch, heads, d_hidden, n_rows, weighted)

        def full(shape):
            return pl.BlockSpec(shape, lambda i, _s=shape: (0,) * len(_s))

        common = [full((1, d_hidden)), full((1, d_hidden)),
                  full((d_hidden, d_out_p)), full((1, d_out_p))]
        out_rows = batch if weighted else n_rows
        cost = pl.CostEstimate(
            flops=2 * out_rows * d_hidden * d_out_p + 10 * n_rows * d_hidden,
            transcendentals=n_rows * d_hidden,
            bytes_accessed=int(x2d.size) * x2d.dtype.itemsize
            + int(w_p.size) * w_p.dtype.itemsize
            + out_rows * d_out_p * jnp.dtype(out_dtype).itemsize)
        cparams = pltpu.CompilerParams(dimension_semantics=("arbitrary",),
                                       vmem_limit_bytes=_VMEM_LIMIT_BYTES)
        if weighted:
            out = pl.pallas_call(
                kernel,
                out_shape=jax.ShapeDtypeStruct((batch, d_out_p), out_dtype),
                grid=(1,),
                in_specs=[full((n_rows, d_hidden)), full((batch, heads))] + common,
                out_specs=full((batch, d_out_p)),
                compiler_params=cparams, cost_estimate=cost,
            )(x2d, relevance_weights, gamma, beta, w_p, b_p)
        else:
            out = pl.pallas_call(
                kernel,
                out_shape=jax.ShapeDtypeStruct((n_rows, d_out_p), out_dtype),
                grid=(1,),
                in_specs=[full((n_rows, d_hidden))] + common,
                out_specs=full((n_rows, d_out_p)),
                compiler_params=cparams, cost_estimate=cost,
            )(x2d, gamma, beta, w_p, b_p)
        return out[:, :d_out]

    # ---------------- general path: pass 1 (global stats) + pass 2 (apply) -----------
    gran = _sublane_granularity(x2d.dtype)
    bt = _choose_batch_tile(batch, heads, d_hidden, gran)
    grid_b = -(-batch // bt)
    batch_p = grid_b * bt
    tile_rows = bt * heads
    rows_p = batch_p * heads

    # Zero-pad to the tile grid: zero rows add nothing to sum / sum-of-squares and
    # padded batches carry zero relevance weights, so results are exact after slicing.
    x2d_p = jnp.pad(x2d, ((0, rows_p - n_rows), (0, 0))) if rows_p != n_rows else x2d

    stat_spec = pl.BlockSpec((1, d_hidden), lambda i: (0, 0))
    x_sum, x_sq = pl.pallas_call(
        _bn_stats_kernel,
        out_shape=(jax.ShapeDtypeStruct((1, d_hidden), jnp.float32),
                   jax.ShapeDtypeStruct((1, d_hidden), jnp.float32)),
        grid=(rows_p // tile_rows,),
        in_specs=[pl.BlockSpec((tile_rows, d_hidden), lambda i: (i, 0))],
        out_specs=(stat_spec, stat_spec),
        compiler_params=pltpu.CompilerParams(dimension_semantics=("arbitrary",),
                                             vmem_limit_bytes=_VMEM_LIMIT_BYTES),
    )(x2d_p)

    # Hoisted BN scale/shift: tiny (1, d_hidden) XLA ops between the two calls.
    # Divide by the TRUE row count; clamp the E[x^2]-mean^2 variance against
    # f32 cancellation so rsqrt never sees a negative argument.
    mean = x_sum / float(n_rows)
    var = jnp.maximum(x_sq / float(n_rows) - mean * mean, 0.0)
    scale = gamma.astype(jnp.float32) * jax.lax.rsqrt(var + BN_EPS)
    shift = beta.astype(jnp.float32) - mean * scale

    kernel = _make_apply_kernel(bt, heads, d_hidden, weighted)
    const_specs = [
        pl.BlockSpec((1, d_hidden), lambda i: (0, 0)),        # scale
        pl.BlockSpec((1, d_hidden), lambda i: (0, 0)),        # shift
        pl.BlockSpec((d_hidden, d_out_p), lambda i: (0, 0)),  # W^T (padded)
        pl.BlockSpec((1, d_out_p), lambda i: (0, 0)),         # bias (padded)
    ]
    mat_rows = batch_p if weighted else rows_p
    cost = pl.CostEstimate(
        flops=2 * mat_rows * d_hidden * d_out_p + 10 * rows_p * d_hidden,
        transcendentals=rows_p * d_hidden,
        bytes_accessed=int(x2d_p.size) * x2d_p.dtype.itemsize
        + int(w_p.size) * w_p.dtype.itemsize
        + mat_rows * d_out_p * jnp.dtype(out_dtype).itemsize)
    cparams = pltpu.CompilerParams(dimension_semantics=("parallel",),
                                   vmem_limit_bytes=_VMEM_LIMIT_BYTES)

    if weighted:
        rw_p = relevance_weights
        if batch_p != batch:
            rw_p = jnp.pad(relevance_weights, ((0, batch_p - batch), (0, 0)))
        out = pl.pallas_call(
            kernel,
            out_shape=jax.ShapeDtypeStruct((batch_p, d_out_p), out_dtype),
            grid=(grid_b,),
            in_specs=[pl.BlockSpec((tile_rows, d_hidden), lambda i: (i, 0)),
                      pl.BlockSpec((bt, heads), lambda i: (i, 0))] + const_specs,
            out_specs=pl.BlockSpec((bt, d_out_p), lambda i: (i, 0)),
            compiler_params=cparams, cost_estimate=cost,
        )(x2d_p, rw_p, scale, shift, w_p, b_p)
        return out[:batch, :d_out]
    else:
        out = pl.pallas_call(
            kernel,
            out_shape=jax.ShapeDtypeStruct((rows_p, d_out_p), out_dtype),
            grid=(grid_b,),
            in_specs=[pl.BlockSpec((tile_rows, d_hidden), lambda i: (i, 0))]
            + const_specs,
            out_specs=pl.BlockSpec((tile_rows, d_out_p), lambda i: (i, 0)),
            compiler_params=cparams, cost_estimate=cost,
        )(x2d_p, scale, shift, w_p, b_p)
        return out[:n_rows, :d_out]


# --------------------------------------------------------------------------- #
# Pure-JAX reference
# --------------------------------------------------------------------------- #
def aggregator_reference(x_concepts_encoded, relevance_weights, params,
                         ignore_relevance_weights=False):
    batch, heads = relevance_weights.shape
    x2d = x_concepts_encoded.reshape(batch * heads, -1).astype(jnp.float32)
    mean = jnp.mean(x2d, axis=0, keepdims=True)
    var = jnp.mean((x2d - mean) ** 2, axis=0, keepdims=True)
    h = (x2d - mean) / jnp.sqrt(var + BN_EPS)
    h = h * params["gamma"][None, :] + params["beta"][None, :]
    h = h * jax.nn.sigmoid(h)
    y = h @ params["w"].T + params["b"][None, :]
    if not ignore_relevance_weights:
        y = (y.reshape(batch, heads, -1) * relevance_weights[:, :, None]).sum(1)
    return y


def _make_inputs(key, batch, heads, d_hidden, d_out):
    kx, kr, kw, kb = jax.random.split(key, 4)
    x = jax.random.normal(kx, (batch, heads, d_hidden), jnp.float32)
    rw = jax.nn.softmax(jax.random.normal(kr, (batch, heads), jnp.float32), axis=-1)
    params = {
        "gamma": jnp.ones((d_hidden,), jnp.float32),
        "beta": jnp.zeros((d_hidden,), jnp.float32),
        "w": jax.random.normal(kw, (d_out, d_hidden), jnp.float32) / jnp.sqrt(d_hidden),
        "b": jax.random.normal(kb, (d_out,), jnp.float32) * 0.01,
    }
    return x, rw, params


if __name__ == "__main__":
    # TODO(synk): BatchNorm1d running-stat (momentum) updates are stateful side
    # effects and are not reproduced; the dropout ctor arg is unused in the
    # original fc Sequential.
    key = jax.random.PRNGKey(0)

    # --- Small shapes: fused single-launch fast path -------------------------------
    Batch, Heads, d_hidden, d_out = 2, 4, 32, 16
    x, rw, params = _make_inputs(key, Batch, Heads, d_hidden, d_out)

    out = jax.block_until_ready(aggregator_forward(x, rw, params))
    ref = aggregator_reference(x, rw, params)
    assert out.shape == (Batch, d_out)
    assert jnp.allclose(out, ref, atol=1e-4, rtol=1e-4)

    out_nw = jax.block_until_ready(
        aggregator_forward(x, rw, params, ignore_relevance_weights=True))
    ref_nw = aggregator_reference(x, rw, params, ignore_relevance_weights=True)
    assert out_nw.shape == (Batch * Heads, d_out)
    assert jnp.allclose(out_nw, ref_nw, atol=1e-4, rtol=1e-4)

    # --- Larger, non-divisible shapes: two-pass tiled path (exercises padding,
    #     global-stat accumulation and the multi-tile parallel grid) ----------------
    Batch2, Heads2, d_hidden2, d_out2 = 250, 8, 640, 24
    x2, rw2, params2 = _make_inputs(jax.random.PRNGKey(1), Batch2, Heads2,
                                    d_hidden2, d_out2)

    out2 = jax.block_until_ready(aggregator_forward(x2, rw2, params2))
    ref2 = aggregator_reference(x2, rw2, params2)
    assert out2.shape == (Batch2, d_out2)
    assert jnp.allclose(out2, ref2, atol=3e-2, rtol=3e-2)

    out2_nw = jax.block_until_ready(
        aggregator_forward(x2, rw2, params2, ignore_relevance_weights=True))
    ref2_nw = aggregator_reference(x2, rw2, params2, ignore_relevance_weights=True)
    assert out2_nw.shape == (Batch2 * Heads2, d_out2)
    assert jnp.allclose(out2_nw, ref2_nw, atol=3e-2, rtol=3e-2)

    print("KERNEL_OK")
</pallas_src>

<mosaic_0001>
module attributes {stable_mosaic.version = 11 : i64} {
  func.func @kernel(%arg0: i32, %arg1: memref<8x32xf32, #tpu.memory_space<vmem>>, %arg2: memref<2x4xf32, #tpu.memory_space<vmem>>, %arg3: memref<1x32xf32, #tpu.memory_space<vmem>>, %arg4: memref<1x32xf32, #tpu.memory_space<vmem>>, %arg5: memref<32x128xf32, #tpu.memory_space<vmem>>, %arg6: memref<1x128xf32, #tpu.memory_space<vmem>>, %arg7: memref<2x128xf32, #tpu.memory_space<vmem>>) attributes {dimension_semantics = [#tpu.dimension_semantics<arbitrary>], iteration_bounds = array<i64: 1>, scalar_prefetch = 0 : i64, scratch_operands = 0 : i64, tpu.core_type = #tpu.core_type<tc>, window_params = [{pipeline_mode = #tpu.pipeline_mode<synchronous>, transform_indices = @transform_0, window_bounds = array<i64: 8, 32>}, {pipeline_mode = #tpu.pipeline_mode<synchronous>, transform_indices = @transform_1, window_bounds = array<i64: 2, 4>}, {pipeline_mode = #tpu.pipeline_mode<synchronous>, transform_indices = @transform_2, window_bounds = array<i64: 1, 32>}, {pipeline_mode = #tpu.pipeline_mode<synchronous>, transform_indices = @transform_3, window_bounds = array<i64: 1, 32>}, {pipeline_mode = #tpu.pipeline_mode<synchronous>, transform_indices = @transform_4, window_bounds = array<i64: 32, 128>}, {pipeline_mode = #tpu.pipeline_mode<synchronous>, transform_indices = @transform_5, window_bounds = array<i64: 1, 128>}, {pipeline_mode = #tpu.pipeline_mode<synchronous>, transform_indices = @transform_6, window_bounds = array<i64: 2, 128>}]} {
    %c0 = arith.constant 0 : index
    %c0_0 = arith.constant 0 : index
    %0 = vector.load %arg1[%c0, %c0_0] : memref<8x32xf32, #tpu.memory_space<vmem>>, vector<8x32xf32>
    %cst = arith.constant dense<0.000000e+00> : vector<32xf32>
    %1 = vector.multi_reduction <add>, %0, %cst [0] : vector<8x32xf32> to vector<32xf32>
    %2 = vector.shape_cast %1 : vector<32xf32> to vector<1x32xf32>
    %cst_1 = arith.constant 1.250000e-01 : f32
    %3 = vector.broadcast %cst_1 : f32 to vector<1x32xf32>
    %4 = arith.mulf %2, %3 : vector<1x32xf32>
    %5 = vector.broadcast %4 : vector<1x32xf32> to vector<8x32xf32>
    %6 = arith.subf %0, %5 : vector<8x32xf32>
    %7 = arith.mulf %6, %6 : vector<8x32xf32>
    %cst_2 = arith.constant dense<0.000000e+00> : vector<32xf32>
    %8 = vector.multi_reduction <add>, %7, %cst_2 [0] : vector<8x32xf32> to vector<32xf32>
    %9 = vector.shape_cast %8 : vector<32xf32> to vector<1x32xf32>
    %cst_3 = arith.constant 1.250000e-01 : f32
    %10 = vector.broadcast %cst_3 : f32 to vector<1x32xf32>
    %11 = arith.mulf %9, %10 : vector<1x32xf32>
    %c0_4 = arith.constant 0 : index
    %c0_5 = arith.constant 0 : index
    %12 = vector.load %arg3[%c0_4, %c0_5] : memref<1x32xf32, #tpu.memory_space<vmem>>, vector<1x32xf32>
    %cst_6 = arith.constant 9.99999974E-6 : f32
    %13 = vector.broadcast %cst_6 : f32 to vector<1x32xf32>
    %14 = arith.addf %11, %13 : vector<1x32xf32>
    %15 = math.rsqrt %14 : vector<1x32xf32>
    %16 = arith.mulf %12, %15 : vector<1x32xf32>
    %17 = vector.broadcast %16 : vector<1x32xf32> to vector<8x32xf32>
    %18 = arith.mulf %6, %17 : vector<8x32xf32>
    %c0_7 = arith.constant 0 : index
    %c0_8 = arith.constant 0 : index
    %19 = vector.load %arg4[%c0_7, %c0_8] : memref<1x32xf32, #tpu.memory_space<vmem>>, vector<1x32xf32>
    %20 = vector.broadcast %19 : vector<1x32xf32> to vector<8x32xf32>
    %21 = arith.addf %18, %20 : vector<8x32xf32>
    %22 = arith.negf %21 : vector<8x32xf32>
    %23 = math.exp %22 : vector<8x32xf32>
    %cst_9 = arith.constant 1.000000e+00 : f32
    %24 = vector.broadcast %cst_9 : f32 to vector<8x32xf32>
    %25 = arith.addf %24, %23 : vector<8x32xf32>
    %26 = arith.divf %24, %25 : vector<8x32xf32>
    %27 = arith.mulf %21, %26 : vector<8x32xf32>
    %c0_10 = arith.constant 0 : index
    %c0_11 = arith.constant 0 : index
    %28 = vector.load %arg2[%c0_10, %c0_11] : memref<2x4xf32, #tpu.memory_space<vmem>>, vector<2x4xf32>
    %29 = vector.shape_cast %27 : vector<8x32xf32> to vector<2x4x32xf32>
    %30 = vector.shape_cast %28 : vector<2x4xf32> to vector<2x4x1xf32>
    %31 = vector.broadcast %30 : vector<2x4x1xf32> to vector<2x4x32xf32>
    %32 = arith.mulf %29, %31 : vector<2x4x32xf32>
    %cst_12 = arith.constant dense<0.000000e+00> : vector<2x32xf32>
    %33 = vector.multi_reduction <add>, %32, %cst_12 [1] : vector<2x4x32xf32> to vector<2x32xf32>
    %c0_13 = arith.constant 0 : index
    %c0_14 = arith.constant 0 : index
    %34 = vector.load %arg5[%c0_13, %c0_14] : memref<32x128xf32, #tpu.memory_space<vmem>>, vector<32x128xf32>
    %cst_15 = arith.constant dense<0.000000e+00> : vector<2x128xf32>
    %35 = tpu.matmul %33, %34, %cst_15 {dimension_numbers = #tpu.dot_dimension_numbers<[1], [0], [0], [1], [0, 0, 1, 1], [], []>} : vector<2x32xf32>, vector<32x128xf32>, vector<2x128xf32> -> vector<2x128xf32>
    %c0_16 = arith.constant 0 : index
    %c0_17 = arith.constant 0 : index
    %36 = vector.load %arg6[%c0_16, %c0_17] : memref<1x128xf32, #tpu.memory_space<vmem>>, vector<1x128xf32>
    %cst_18 = arith.constant dense<0.000000e+00> : vector<2xf32>
    %37 = vector.multi_reduction <add>, %28, %cst_18 [1] : vector<2x4xf32> to vector<2xf32>
    %38 = vector.shape_cast %37 : vector<2xf32> to vector<2x1xf32>
    %39 = vector.broadcast %36 : vector<1x128xf32> to vector<2x128xf32>
    %40 = vector.broadcast %38 : vector<2x1xf32> to vector<2x128xf32>
    %41 = arith.mulf %39, %40 : vector<2x128xf32>
    %42 = arith.addf %35, %41 : vector<2x128xf32>
    %c0_19 = arith.constant 0 : index
    %c0_20 = arith.constant 0 : index
    %43 = vector.load %arg7[%c0_19, %c0_20] : memref<2x128xf32, #tpu.memory_space<vmem>>, vector<2x128xf32>
    tpu.vector_store %arg7[%c0_19, %c0_20], %42 {strides = array<i32>} : memref<2x128xf32, #tpu.memory_space<vmem>>, vector<2x128xf32>,
    return
  }
  func.func @transform_0(%arg0: i32) -> (i32, i32) {
    %c0_i32 = arith.constant 0 : i32
    %c0_i32_0 = arith.constant 0 : i32
    %c0_i32_1 = arith.constant 0 : i32
    return %c0_i32, %c0_i32_0 : i32, i32
  }
  func.func @transform_1(%arg0: i32) -> (i32, i32) {
    %c0_i32 = arith.constant 0 : i32
    %c0_i32_0 = arith.constant 0 : i32
    %c0_i32_1 = arith.constant 0 : i32
    return %c0_i32, %c0_i32_0 : i32, i32
  }
  func.func @transform_2(%arg0: i32) -> (i32, i32) {
    %c0_i32 = arith.constant 0 : i32
    %c0_i32_0 = arith.constant 0 : i32
    %c0_i32_1 = arith.constant 0 : i32
    return %c0_i32, %c0_i32_0 : i32, i32
  }
  func.func @transform_3(%arg0: i32) -> (i32, i32) {
    %c0_i32 = arith.constant 0 : i32
    %c0_i32_0 = arith.constant 0 : i32
    %c0_i32_1 = arith.constant 0 : i32
    return %c0_i32, %c0_i32_0 : i32, i32
  }
  func.func @transform_4(%arg0: i32) -> (i32, i32) {
    %c0_i32 = arith.constant 0 : i32
    %c0_i32_0 = arith.constant 0 : i32
    %c0_i32_1 = arith.constant 0 : i32
    return %c0_i32, %c0_i32_0 : i32, i32
  }
  func.func @transform_5(%arg0: i32) -> (i32, i32) {
    %c0_i32 = arith.constant 0 : i32
    %c0_i32_0 = arith.constant 0 : i32
    %c0_i32_1 = arith.constant 0 : i32
    return %c0_i32, %c0_i32_0 : i32, i32
  }
  func.func @transform_6(%arg0: i32) -> (i32, i32) {
    %c0_i32 = arith.constant 0 : i32
    %c0_i32_0 = arith.constant 0 : i32
    %c0_i32_1 = arith.constant 0 : i32
    return %c0_i32, %c0_i32_0 : i32, i32
  }
}

</mosaic_0001>

<bundles_post_ra>
// kernel: tpu_custom_call.1
= control target key start
LH: loop header
LB: loop body
LE: loop exit
PB: predicated region body
PF: predicated region fallthrough
CT: control target
= control target key end

     0   :  { %11 = vsyncpa [#allocation3], 0  ;;  %s438_s0 = inlined_call_operand.hbm [shape: f32[8,32], index: 0, kind: input, shape index: {}]   ;;  %s439_s1 = inlined_call_operand.hbm [shape: f32[2,4], index: 1, kind: input, shape index: {}]   ;;  %s440_s2 = inlined_call_operand.vmem [shape: f32[1,32], index: 2, kind: input, shape index: {}]   ;;  %s441_s3 = inlined_call_operand.vmem [shape: f32[1,32], index: 3, kind: input, shape index: {}]   ;;  %s442_s4 = inlined_call_operand.hbm [shape: f32[32,128], index: 4, kind: input, shape index: {}]   ;;  %s443_s5 = inlined_call_operand.vmem [shape: f32[1,128], index: 5, kind: input, shape index: {}]   ;;  %s444_s6 = inlined_call_operand.hbm [shape: f32[2,128], index: 6, kind: output, shape index: {}]  }
   0x1   :  { %12 = vsyncpa [#allocation6], 0 }
   0x2   :  { %13 = vsyncpa [#allocation4], 0  ;;  %s371_s21 = smov [#allocation5]   ;;  %s372_s23 = smov [#allocation2]  }
   0x3   :  { %s30_s22 = sshll.u32 %s371_s21, 4  ;;  %s20_s24 = sshll.u32 %s372_s23, 4  ;;  %s31_s22 = int_to_ptr.vmem [resolvable:$true] %s30_s22  ;;  %s21_s24 = int_to_ptr.vmem [resolvable:$true] %s20_s24 }
   0x4   :  { %s293_s25 = scalar_lea.vmem %s31_s22, 32  ;;  %p298_p1 = scmp.lt.s32.totalorder %s31_s22, %s31_s22 }
   0x5   :  { %p294_p0 = scmp.ne.s32.totalorder %s31_s22, %s293_s25  ;;  %p299_p2 = scmp.lt.s32.totalorder %s293_s25, %s293_s25 }
   0x7   :  { %p300_p3 = por %p299_p2, %p298_p1 }
   0x9   :  { %p301_p4 = pnand %p300_p3, %p294_p0 }
   0xb   :  { %304 = shalt.err (!%p301_p4)
}
   0xc   :  { %33 = dma.hbm_to_vmem [thread:$0]  %s439_s1, 32, %s31_s22, [#allocation6]  }
   0xd   :  { %s313_s28 = scalar_lea.vmem %s21_s24, 128  ;;  %p318_p6 = scmp.lt.s32.totalorder %s21_s24, %s21_s24 }
   0xe   :  { %p314_p5 = scmp.ne.s32.totalorder %s21_s24, %s313_s28  ;;  %p319_p7 = scmp.lt.s32.totalorder %s313_s28, %s313_s28 }
  0x10   :  { %p320_p8 = por %p319_p7, %p318_p6 }
  0x12   :  { %p321_p9 = pnand %p320_p8, %p314_p5 }
  0x14   :  { %324 = shalt.err (!%p321_p9)
}
  0x15   :  { %23 = dma.hbm_to_vmem [thread:$0]  %s438_s0, 128, %s21_s24, [#allocation3]  }
  0x16   :  { %s373_s7 = smov [#allocation7]  }
  0x17   :  { %s43_s8 = sshll.u32 %s373_s7, 4  ;;  %s44_s8 = int_to_ptr.vmem [resolvable:$true] %s43_s8 }
  0x18   :  { %s333_s9 = scalar_lea.vmem %s44_s8, 512  ;;  %p338_p11 = scmp.lt.s32.totalorder %s44_s8, %s44_s8 }
  0x19   :  { %p334_p10 = scmp.ne.s32.totalorder %s44_s8, %s333_s9  ;;  %p339_p12 = scmp.lt.s32.totalorder %s333_s9, %s333_s9 }
  0x1b   :  { %p340_p13 = por %p339_p12, %p338_p11 }
  0x1d   :  { %p341_p0 = pnand %p340_p13, %p334_p10 }
  0x1f   :  { %344 = shalt.err (!%p341_p0)
}
  0x20   :  { %s374_s1 = smov 128   ;;  %s375_s10 = smov 8  }
  0x21   :  { %49 = dma.hbm_to_vmem [thread:$0]  %s442_s4, 512, %s44_s8, [#allocation6], %s374_s1, %s374_s1, %s375_s10  }
  0x22   :  { %365 = dma.done.wait [#allocation3], 128  }
  0x23   :  { %366 = vsyncadd [#allocation3], 4294967168 }
  0x24   :  { %367 = dma.done.wait [#allocation6], 544  }
  0x25   :  { %368 = vsyncadd [#allocation6], 4294966752  ;;  %v86_v0 = vlaneseq  ;;  %vm62_vm0 = vcmask 261120   ;;  %v107_v4 = vld [vmem:[#allocation5] sm:$0x3]  ;;  %v61_v5 = vld [vmem:[#allocation2] sm:$0xff] }
  0x26   :  { %v63_v7 = vsel %vm62_vm0, %v61_v5, 0.0  ;;  %v376_v9 = vmov 0.0   ;;  %v145_v10 = vld [vmem:[#allocation7 + $0x18] sm:$0xff]  ;;  %v144_v13 = vld [vmem:[#allocation7 + $0x10] sm:$0xff]  ;;  %v143_v15 = vld [vmem:[#allocation7 + $0x8] sm:$0xff]  ;;  %vm377_vm1 = vmmov 0  }
  0x27   :  { %v87_v1 = vshrl.u32 %v86_v0, 7  ;;  %v64_v8 = vrot.slane %v63_v7, 4  ;;  %260 = vmatprep.subr.mxu0 %v376_v9  ;;  %v142_v16 = vld [vmem:[#allocation7] sm:$0xff]  ;;  %268 = vmatprep.mubr.msk.f32.mxu0 %vm377_vm1, %v376_v9  ;;  %vm147_vm2 = vcmask 25600   ;;  %v81_v34 = vld [vmem:[%s440_s2] sm:$0x1] }
  0x28   :  { %261 = vmatpush3.msra.mxu0 %v145_v10  ;;  %v148_v19 = vsel %vm147_vm2, %v107_v4, 0.0  ;;  %v251_v38 = vld [vmem:[%s441_s3] ss:$0 sm:$0xff]  ;;  %vm127_vm3 = vcmask 257024   ;;  %vm160_vm4 = vcmask 1041409   ;;  %s378_s15 = smov [#allocation8]  }
  0x29   :  { %v88_v2 = vsub.s32 0, %v87_v1  ;;  %v120_v3 = vsub.s32 1, %v87_v1  ;;  %v65_v12 = vadd.f32 %v64_v8, %v63_v7  ;;  %262 = vmatprep.subr.mxu0 %v376_v9  ;;  %149 = vadd.xlane.f32.xlu1 %v148_v19  ;;  %v253_v1 = vld [vmem:[%s443_s5] ss:$0 sm:$0xff]  ;;  %s241_s16 = sshll.u32 %s378_s15, 4  ;;  %s242_s16 = int_to_ptr.vmem [resolvable:$true] %s241_s16 }
  0x2a   :  { %263 = vmatpush3.msra.mxu0 %v144_v13  ;;  %s345_s17 = scalar_lea.vmem %s242_s16, 32  ;;  %p350_p2 = scmp.lt.s32.totalorder %s242_s16, %s242_s16 }
  0x2b   :  { %v114_v6 = vrot.slane %v107_v4, %v88_v2  ;;  %v121_v11 = vrot.slane %v107_v4, %v120_v3  ;;  %v66_v14 = vrot.slane %v65_v12, 2  ;;  %264 = vmatprep.subr.mxu0 %v376_v9  ;;  %p346_p1 = scmp.ne.s32.totalorder %s242_s16, %s345_s17  ;;  %p351_p3 = scmp.lt.s32.totalorder %s345_s17, %s345_s17 }
  0x2c   :  { %265 = vmatpush3.msra.mxu0 %v143_v15 }
  0x2d   :  { %116 = vbcast.lane.b32.xlu0 %v114_v6, 256  ;;  %v67_v17 = vadd.f32 %v66_v14, %v65_v12  ;;  %266 = vmatprep.subr.mxu0 %v376_v9  ;;  %p352_p4 = por %p351_p3, %p350_p2 }
  0x2e   :  { %267 = vmatpush3.msra.mxu0 %v142_v16 }
  0x2f   :  { %v68_v18 = vrot.slane %v67_v17, 1  ;;  %p353_p5 = pnand %p352_p4, %p346_p1 }
  0x31   :  { %123 = vbcast.lane.b32.xlu0 %v121_v11, 256  ;;  %v69_v20 = vadd.f32 %v68_v18, %v67_v17 }
  0x33   :  { %v70_v21 = vmul.f32 0.125, %v69_v20 }
  0x35   :  { %v71_v22 = vsub.f32 %v61_v5, %v70_v21 }
  0x37   :  { %v72_v23 = vmul.f32 %v71_v22, %v71_v22 }
  0x39   :  { %v73_v24 = vsel %vm62_vm0, %v72_v23, 0.0 }
  0x3a   :  { %v74_v25 = vrot.slane %v73_v24, 4 }
  0x3c   :  { %v75_v26 = vadd.f32 %v74_v25, %v73_v24 }
  0x3e   :  { %v76_v27 = vrot.slane %v75_v26, 2 }
  0x40   :  { %v77_v28 = vadd.f32 %v76_v27, %v75_v26 }
  0x42   :  { %v78_v29 = vrot.slane %v77_v28, 1 }
  0x44   :  { %v79_v30 = vadd.f32 %v78_v29, %v77_v28 }
  0x46   :  { %v80_v31 = vmul.f32 0.125, %v79_v30 }
  0x48   :  { %v82_v32 = vadd.f32 1e-05, %v80_v31 }
  0x4a   :  { %279 = vrsqrt.f32 %v82_v32 }
  0x57   :  { %v280_v33 = vpop.eup %279 }
  0x58   :  { %v84_v35 = vmul.f32 %v280_v33, %v81_v34 }
  0x5a   :  { %v89_v36 = vrot.slane %v84_v35, %v88_v2 }
  0x5c   :  { %v91_v37 = vmul.f32 %v89_v36, %v71_v22 }
  0x5e   :  { %v99_v39 = vadd.f32 %v251_v38, %v91_v37 }
  0x60   :  { %v252_v40 = vmul.f32 -1.442695, %v99_v39 }
  0x62   :  { %281 = vpow2.f32 %v252_v40 }
  0x6f   :  { %v282_v41 = vpop.eup %281 }
  0x70   :  { %v103_v42 = vadd.f32 1.0, %v282_v41 }
  0x72   :  { %283 = vrcp.f32 %v103_v42 }
  0x7f   :  { %v284_v43 = vpop.eup %283 }
  0x80   :  { %v106_v44 = vmul.f32 %v284_v43, %v99_v39 }
  0x82   :  { %v109_v47 = vcombine.high %v106_v44, %v106_v44 }
  0x9f   :  { %v117_v45 = vpop.permute.xlu0 %116 }
  0xa0   :  { %v125_v46 = vmul.f32 %v117_v45, %v106_v44 }
  0xa2   :  { %v128_v48 = vsel %vm127_vm3, %v125_v46, 0.0 }
  0xa3   :  { %v129_v49 = vrot.slane %v128_v48, 4  ;;  %v124_v50 = vpop.permute.xlu0 %123 }
  0xa4   :  { %v126_v51 = vmul.f32 %v124_v50, %v109_v47 }
  0xa5   :  { %v130_v52 = vadd.f32 %v129_v49, %v128_v48 }
  0xa6   :  { %v135_v53 = vsel %vm127_vm3, %v126_v51, 0.0 }
  0xa7   :  { %v131_v54 = vrot.slane %v130_v52, 2  ;;  %v136_v55 = vrot.slane %v135_v53, 4 }
  0xa9   :  { %v132_v56 = vadd.f32 %v131_v54, %v130_v52  ;;  %v137_v57 = vadd.f32 %v136_v55, %v135_v53 }
  0xab   :  { %v138_v58 = vrot.slane %v137_v57, 2  ;;  %v133_v59 = vrot.slane %v132_v56, 1 }
  0xad   :  { %v139_v60 = vadd.f32 %v138_v58, %v137_v57  ;;  %v134_v62 = vadd.f32 %v133_v59, %v132_v56 }
  0xaf   :  { %v140_v61 = vrot.slane %v139_v60, 1 }
  0xb1   :  { %v141_v63 = vadd.f32 %v140_v61, %v139_v60 }
  0xb2   :  { %v150_v2 = vpop.xlane.xlu1 %149 }
  0xb3   :  { %v161_v0 = vsel %vm160_vm4, %v141_v63, %v134_v62  ;;  %v157_v3 = vmul.f32 %v253_v1, %v150_v2 }
  0xb4   :  { %269 = vmatmul.mubr.msk.f32.vlgmr.msra.gmra.mxu0 %vm62_vm0, %v161_v0 }
 0x174   :  { %v230_v4 = vpop.f32.mrf.mxu0 }
 0x175   :  { %v231_v5 = vadd.f32 %v230_v4, %v157_v3 }
 0x176   :  { %v270_v6 = vpop.f32.mrf.mxu0 }
 0x177   :  { %234 = vst [vmem:[#allocation8] sm:$0x3] %v231_v5 }
 0x178   :  { %356 = shalt.err (!%p353_p5)
}
 0x179   :  { %244 = dma.vmem_to_hbm [thread:$0]  %s242_s16, 32, %s444_s6, [#allocation4]  }
 0x17a   :  { %369 = dma.done.wait [#allocation4], 32  }
 0x17b   :  { %370 = vsyncadd [#allocation4], 4294967264 }
 0x17c   :  { %248 = vsyncpa [#allocation3], 1 }
 0x17d   :  { %249 = vsyncpa [#allocation6], 1 }
 0x17e   :  { %250 = vsyncpa [#allocation4], 1 }

</bundles_post_ra>
